<compile_context>
chip_gen: v7x
topology: tpu7x:2x2x1
jax: 0.10.0
libtpu: 0.0.40
codegen_flags: <defaults>
</compile_context>

<pallas_src>
import functools
import math

import jax
import jax.numpy as jnp
import numpy as np
from jax.experimental import pallas as pl
from jax.experimental.pallas import tpu as pltpu


def _pick_vmem_limit_bytes(frac=0.75, fallback_bytes=64 * 1024 * 1024):
    """Per-generation VMEM cap (v5e/v6e: 128 MiB, v7x: 64 MiB) with headroom."""
    try:
        cap = int(pltpu.get_tpu_info().vmem_capacity_bytes)
        if cap <= 0:
            cap = fallback_bytes
    except Exception:
        cap = fallback_bytes
    return int(cap * frac)


def _mha_flash_kernel(qh_ref, kh_ref, vh_ref, wo_ref, bo_ref, o_ref,
                      m_s, l_s, acc_s, *, compute_dtype, exp_dtype,
                      recip_approx):
    """Flash attention over ALL heads of one (batch, q-tile); kv innermost."""
    kv = pl.program_id(2)
    nkv = pl.num_programs(2)

    # Reset the online-softmax statistics at the start of each (b, q-tile).
    @pl.when(kv == 0)
    def _():
        m_s[...] = jnp.full(m_s.shape, -jnp.inf, m_s.dtype)
        l_s[...] = jnp.zeros(l_s.shape, l_s.dtype)
        acc_s[...] = jnp.zeros(acc_s.shape, acc_s.dtype)

    # Scores for all heads at once: (H, tq, tk); contraction over dk directly
    # (no materialized K^T).  Q is already projected + scaled in the wrapper.
    s = jnp.einsum("hqd,hkd->hqk", qh_ref[...], kh_ref[...],
                   preferred_element_type=jnp.float32)

    # Online softmax update — statistics in f32, exp in exp_dtype (bf16 on
    # v6e/v7x to double EUP throughput; f32 on the verification path / v5e).
    m_prev = m_s[...]                                              # (H, tq, 1)
    m_new = jnp.maximum(m_prev, jnp.max(s, axis=-1, keepdims=True))
    alpha = jnp.exp(m_prev - m_new)                                # f32, tiny
    p = jnp.exp((s - m_new).astype(exp_dtype))                     # (H, tq, tk)
    l_s[...] = alpha * l_s[...] + jnp.sum(p.astype(jnp.float32),
                                          axis=-1, keepdims=True)
    acc_s[...] = alpha * acc_s[...] + jnp.einsum(
        "hqk,hkd->hqd", p.astype(compute_dtype), vh_ref[...],
        preferred_element_type=jnp.float32)
    m_s[...] = m_new

    # Finalize: normalize once, concatenate heads along the lane axis with
    # STATIC slices, and do ONE deep (tq, Dv) @ (Dv, Dm) output projection.
    @pl.when(kv == nkv - 1)
    def _():
        inv_l = pl.reciprocal(l_s[...], approx=recip_approx)       # (H, tq, 1)
        head_out = (acc_s[...] * inv_l).astype(compute_dtype)      # (H, tq, dv)
        num_head = head_out.shape[0]
        cat = jnp.concatenate([head_out[h] for h in range(num_head)],
                              axis=-1)                             # (tq, Dv)
        proj = jnp.dot(cat, wo_ref[...],
                       preferred_element_type=jnp.float32)         # (tq, Dm)
        o_ref[...] = (proj + bo_ref[...]).astype(o_ref.dtype)


def multi_head_attention(q, k, v, wq, wk, wv, wo, bo, *, num_head,
                         compute_dtype=jnp.bfloat16, exp_dtype=None,
                         q_tile=256, kv_tile=512):
    B, T, Dm = q.shape
    Dk = wq.shape[1]
    Dv = wv.shape[1]
    assert Dk % num_head == 0 and Dv % num_head == 0
    dk = Dk // num_head
    dv = Dv // num_head
    out_dtype = q.dtype
    scale = 1.0 / math.sqrt(dk)
    if exp_dtype is None:
        exp_dtype = compute_dtype   # TODO(synk): pass jnp.float32 on v5e.

    tq = min(q_tile, T)
    tk = min(kv_tile, T)
    assert T % tq == 0 and T % tk == 0, "sequence length must divide tiles"
    nq = T // tq
    nkv = T // tk

    # Hoisted projections (review opt #1): one einsum each, emitted in
    # per-head (B, H, T, d) layout so the kernel never re-projects K/V per
    # q-tile.  1/sqrt(dk) is folded into Wq (opt #7) — weight-side, one-time.
    def project(x, w, d):
        w_h = w.reshape(Dm, num_head, d).astype(compute_dtype)
        return jnp.einsum("btd,dhe->bhte", x.astype(compute_dtype), w_h,
                          preferred_element_type=jnp.float32
                          ).astype(compute_dtype)

    qh = project(q, wq * scale, dk)   # (B, H, T, dk), pre-scaled
    kh = project(k, wk, dk)           # (B, H, T, dk)
    vh = project(v, wv, dv)           # (B, H, T, dv)

    wo_c = wo.astype(compute_dtype)               # (Dv, Dm), unsplit (opt #2)
    bo2 = bo.reshape(1, Dm).astype(jnp.float32)

    recip_approx = bool(np.dtype(compute_dtype) != np.dtype(np.float32))

    kernel = functools.partial(_mha_flash_kernel,
                               compute_dtype=compute_dtype,
                               exp_dtype=exp_dtype,
                               recip_approx=recip_approx)

    return pl.pallas_call(
        kernel,
        out_shape=jax.ShapeDtypeStruct((B, T, Dm), out_dtype),
        grid_spec=pltpu.PrefetchScalarGridSpec(
            num_scalar_prefetch=0,
            grid=(B, nq, nkv),
            in_specs=[
                pl.BlockSpec((None, num_head, tq, dk),
                             lambda b, qi, kv: (b, 0, qi, 0)),   # Q (proj, scaled)
                pl.BlockSpec((None, num_head, tk, dk),
                             lambda b, qi, kv: (b, 0, kv, 0)),   # K (proj)
                pl.BlockSpec((None, num_head, tk, dv),
                             lambda b, qi, kv: (b, 0, kv, 0)),   # V (proj)
                pl.BlockSpec((Dv, Dm), lambda b, qi, kv: (0, 0)),  # Wo (unsplit)
                pl.BlockSpec((1, Dm), lambda b, qi, kv: (0, 0)),   # bias
            ],
            out_specs=pl.BlockSpec((None, tq, Dm),
                                   lambda b, qi, kv: (b, qi, 0)),
            scratch_shapes=[
                pltpu.VMEM((num_head, tq, 1), jnp.float32),   # running max m
                pltpu.VMEM((num_head, tq, 1), jnp.float32),   # running denom l
                pltpu.VMEM((num_head, tq, dv), jnp.float32),  # per-head PV acc
            ],
        ),
        compiler_params=pltpu.CompilerParams(
            dimension_semantics=("parallel", "parallel", "arbitrary"),
            vmem_limit_bytes=_pick_vmem_limit_bytes(),
        ),
    )(qh, kh, vh, wo_c, bo2)


def reference_mha(q, k, v, wq, wk, wv, wo, bo, *, num_head):
    """Pure-JAX f32 reference matching the PyTorch module's forward."""
    B, T, Dm = q.shape
    qp, kp, vp = q @ wq, k @ wk, v @ wv

    def split(x):
        return x.reshape(B, T, num_head, x.shape[-1] // num_head).transpose(0, 2, 1, 3)

    qs, ks, vs = split(qp), split(kp), split(vp)
    dk = qs.shape[-1]
    scores = jnp.einsum("bhqd,bhkd->bhqk", qs, ks) / math.sqrt(dk)
    attn = jax.nn.softmax(scores, axis=-1)
    out = jnp.einsum("bhqk,bhkd->bhqd", attn, vs)
    out = out.transpose(0, 2, 1, 3).reshape(B, T, -1)
    return out @ wo + bo.reshape(1, Dm)


if __name__ == "__main__":
    # Small config consistent with the module: batch=2, seq=8, model_dim=32,
    # num_head=4 (head dim 8); linear_key_dim = linear_value_dim = model_dim.
    B, T, Dm, H = 2, 8, 32, 4
    Dk, Dv = Dm, Dm

    key = jax.random.PRNGKey(0)
    k_q, k_k, k_v, k_wq, k_wk, k_wv, k_wo, k_bo = jax.random.split(key, 8)

    q = jax.random.normal(k_q, (B, T, Dm), dtype=jnp.float32)
    k = jax.random.normal(k_k, (B, T, Dm), dtype=jnp.float32)
    v = jax.random.normal(k_v, (B, T, Dm), dtype=jnp.float32)

    def init_w(rng, fan_in, fan_out):
        bound = 1.0 / math.sqrt(fan_in)
        return jax.random.uniform(rng, (fan_in, fan_out), jnp.float32, -bound, bound)

    wq = init_w(k_wq, Dm, Dk)
    wk = init_w(k_wk, Dm, Dk)
    wv = init_w(k_wv, Dm, Dv)
    wo = init_w(k_wo, Dv, Dm)
    bo = jax.random.uniform(k_bo, (1, Dm), jnp.float32,
                            -1.0 / math.sqrt(Dv), 1.0 / math.sqrt(Dv))

    ref = reference_mha(q, k, v, wq, wk, wv, wo, bo, num_head=H)

    # f32-operand path: exact reciprocal + f32 exp → tight tolerance
    # (flash reordering only).
    out_f32 = multi_head_attention(q, k, v, wq, wk, wv, wo, bo, num_head=H,
                                   compute_dtype=jnp.float32)
    out_f32 = jax.block_until_ready(out_f32)
    assert out_f32.shape == (B, T, Dm)
    assert jnp.allclose(out_f32, ref, atol=5e-3, rtol=5e-3), "f32 mismatch vs reference"

    # bf16 MXU-operand fast path (default): bf16 exp + approx reciprocal.
    out_bf16 = multi_head_attention(q, k, v, wq, wk, wv, wo, bo, num_head=H,
                                    compute_dtype=jnp.bfloat16)
    out_bf16 = jax.block_until_ready(out_bf16)
    assert out_bf16.shape == (B, T, Dm)
    assert jnp.allclose(out_bf16, ref, atol=5e-2, rtol=5e-2), "bf16 mismatch vs reference"

    print("KERNEL_OK")
</pallas_src>

<mosaic_0001>
module attributes {stable_mosaic.version = 11 : i64} {
  func.func @_mha_flash_kernel(%arg0: i32, %arg1: i32, %arg2: i32, %arg3: memref<1x4x8x8xf32, #tpu.memory_space<vmem>>, %arg4: memref<1x4x8x8xf32, #tpu.memory_space<vmem>>, %arg5: memref<1x4x8x8xf32, #tpu.memory_space<vmem>>, %arg6: memref<32x32xf32, #tpu.memory_space<vmem>>, %arg7: memref<1x32xf32, #tpu.memory_space<vmem>>, %arg8: memref<1x8x32xf32, #tpu.memory_space<vmem>>, %arg9: memref<4x8x1xf32, #tpu.memory_space<vmem>>, %arg10: memref<4x8x1xf32, #tpu.memory_space<vmem>>, %arg11: memref<4x8x8xf32, #tpu.memory_space<vmem>>) attributes {dimension_semantics = [#tpu.dimension_semantics<parallel>, #tpu.dimension_semantics<parallel>, #tpu.dimension_semantics<arbitrary>], iteration_bounds = array<i64: 2, 1, 1>, scalar_prefetch = 0 : i64, scratch_operands = 3 : i64, tpu.core_type = #tpu.core_type<tc>, window_params = [{transform_indices = @transform_0, window_bounds = array<i64: 1, 4, 8, 8>}, {transform_indices = @transform_1, window_bounds = array<i64: 1, 4, 8, 8>}, {transform_indices = @transform_2, window_bounds = array<i64: 1, 4, 8, 8>}, {pipeline_mode = #tpu.pipeline_mode<synchronous>, transform_indices = @transform_3, window_bounds = array<i64: 32, 32>}, {pipeline_mode = #tpu.pipeline_mode<synchronous>, transform_indices = @transform_4, window_bounds = array<i64: 1, 32>}, {transform_indices = @transform_5, window_bounds = array<i64: 1, 8, 32>}]} {
    %c0_i32 = arith.constant 0 : i32
    %0 = arith.cmpi eq, %arg2, %c0_i32 : i32
    %1 = arith.extui %0 : i1 to i32
    %c0_i32_0 = arith.constant 0 : i32
    %2 = arith.cmpi ne, %1, %c0_i32_0 : i32
    scf.if %2 {
      %cst_35 = arith.constant 0xFF800000 : f32
      %35 = vector.broadcast %cst_35 : f32 to vector<4x8x1xf32>
      %c0_36 = arith.constant 0 : index
      %c0_37 = arith.constant 0 : index
      %c0_38 = arith.constant 0 : index
      %36 = vector.load %arg9[%c0_36, %c0_37, %c0_38] : memref<4x8x1xf32, #tpu.memory_space<vmem>>, vector<4x8x1xf32>
      tpu.vector_store %arg9[%c0_36, %c0_37, %c0_38], %35 {strides = array<i32>} : memref<4x8x1xf32, #tpu.memory_space<vmem>>, vector<4x8x1xf32>,
      %cst_39 = arith.constant 0.000000e+00 : f32
      %37 = vector.broadcast %cst_39 : f32 to vector<4x8x1xf32>
      %c0_40 = arith.constant 0 : index
      %c0_41 = arith.constant 0 : index
      %c0_42 = arith.constant 0 : index
      %38 = vector.load %arg10[%c0_40, %c0_41, %c0_42] : memref<4x8x1xf32, #tpu.memory_space<vmem>>, vector<4x8x1xf32>
      tpu.vector_store %arg10[%c0_40, %c0_41, %c0_42], %37 {strides = array<i32>} : memref<4x8x1xf32, #tpu.memory_space<vmem>>, vector<4x8x1xf32>,
      %cst_43 = arith.constant 0.000000e+00 : f32
      %39 = vector.broadcast %cst_43 : f32 to vector<4x8x8xf32>
      %c0_44 = arith.constant 0 : index
      %c0_45 = arith.constant 0 : index
      %c0_46 = arith.constant 0 : index
      %40 = vector.load %arg11[%c0_44, %c0_45, %c0_46] : memref<4x8x8xf32, #tpu.memory_space<vmem>>, vector<4x8x8xf32>
      tpu.vector_store %arg11[%c0_44, %c0_45, %c0_46], %39 {strides = array<i32>} : memref<4x8x8xf32, #tpu.memory_space<vmem>>, vector<4x8x8xf32>,
    } else {
    }
    %c0 = arith.constant 0 : index
    %c0_1 = arith.constant 0 : index
    %c0_2 = arith.constant 0 : index
    %c0_3 = arith.constant 0 : index
    %3 = vector.load %arg3[%c0, %c0_1, %c0_2, %c0_3] : memref<1x4x8x8xf32, #tpu.memory_space<vmem>>, vector<1x4x8x8xf32>
    %4 = vector.shape_cast %3 : vector<1x4x8x8xf32> to vector<4x8x8xf32>
    %c0_4 = arith.constant 0 : index
    %c0_5 = arith.constant 0 : index
    %c0_6 = arith.constant 0 : index
    %c0_7 = arith.constant 0 : index
    %5 = vector.load %arg4[%c0_4, %c0_5, %c0_6, %c0_7] : memref<1x4x8x8xf32, #tpu.memory_space<vmem>>, vector<1x4x8x8xf32>
    %6 = vector.shape_cast %5 : vector<1x4x8x8xf32> to vector<4x8x8xf32>
    "tpu.trace_start"() <{level = 10 : i32, message = "hqd,hkd->hqk"}> : () -> ()
    %cst = arith.constant dense<0.000000e+00> : vector<4x8x8xf32>
    %7 = tpu.matmul %4, %6, %cst {dimension_numbers = #tpu.dot_dimension_numbers<[2], [2], [1], [1], [0, 0, 0, 1, 1, 1], [0], [0]>} : vector<4x8x8xf32>, vector<4x8x8xf32>, vector<4x8x8xf32> -> vector<4x8x8xf32>
    "tpu.trace_stop"() : () -> ()
    %c0_8 = arith.constant 0 : index
    %c0_9 = arith.constant 0 : index
    %c0_10 = arith.constant 0 : index
    %8 = vector.load %arg9[%c0_8, %c0_9, %c0_10] : memref<4x8x1xf32, #tpu.memory_space<vmem>>, vector<4x8x1xf32>
    %cst_11 = arith.constant dense<0xFF800000> : vector<4x8xf32>
    %9 = vector.multi_reduction <maximumf>, %7, %cst_11 [2] : vector<4x8x8xf32> to vector<4x8xf32>
    %10 = vector.shape_cast %9 : vector<4x8xf32> to vector<4x8x1xf32>
    %11 = arith.maximumf %8, %10 : vector<4x8x1xf32>
    %12 = arith.subf %8, %11 : vector<4x8x1xf32>
    %13 = math.exp %12 : vector<4x8x1xf32>
    %14 = vector.broadcast %11 : vector<4x8x1xf32> to vector<4x8x8xf32>
    %15 = arith.subf %7, %14 : vector<4x8x8xf32>
    %16 = math.exp %15 : vector<4x8x8xf32>
    %c0_12 = arith.constant 0 : index
    %c0_13 = arith.constant 0 : index
    %c0_14 = arith.constant 0 : index
    %17 = vector.load %arg10[%c0_12, %c0_13, %c0_14] : memref<4x8x1xf32, #tpu.memory_space<vmem>>, vector<4x8x1xf32>
    %18 = arith.mulf %13, %17 : vector<4x8x1xf32>
    %cst_15 = arith.constant dense<0.000000e+00> : vector<4x8xf32>
    %19 = vector.multi_reduction <add>, %16, %cst_15 [2] : vector<4x8x8xf32> to vector<4x8xf32>
    %20 = vector.shape_cast %19 : vector<4x8xf32> to vector<4x8x1xf32>
    %21 = arith.addf %18, %20 : vector<4x8x1xf32>
    %c0_16 = arith.constant 0 : index
    %c0_17 = arith.constant 0 : index
    %c0_18 = arith.constant 0 : index
    %22 = vector.load %arg10[%c0_16, %c0_17, %c0_18] : memref<4x8x1xf32, #tpu.memory_space<vmem>>, vector<4x8x1xf32>
    tpu.vector_store %arg10[%c0_16, %c0_17, %c0_18], %21 {strides = array<i32>} : memref<4x8x1xf32, #tpu.memory_space<vmem>>, vector<4x8x1xf32>,
    %c0_19 = arith.constant 0 : index
    %c0_20 = arith.constant 0 : index
    %c0_21 = arith.constant 0 : index
    %23 = vector.load %arg11[%c0_19, %c0_20, %c0_21] : memref<4x8x8xf32, #tpu.memory_space<vmem>>, vector<4x8x8xf32>
    %24 = vector.broadcast %13 : vector<4x8x1xf32> to vector<4x8x8xf32>
    %25 = arith.mulf %24, %23 : vector<4x8x8xf32>
    %c0_22 = arith.constant 0 : index
    %c0_23 = arith.constant 0 : index
    %c0_24 = arith.constant 0 : index
    %c0_25 = arith.constant 0 : index
    %26 = vector.load %arg5[%c0_22, %c0_23, %c0_24, %c0_25] : memref<1x4x8x8xf32, #tpu.memory_space<vmem>>, vector<1x4x8x8xf32>
    %27 = vector.shape_cast %26 : vector<1x4x8x8xf32> to vector<4x8x8xf32>
    "tpu.trace_start"() <{level = 10 : i32, message = "hqk,hkd->hqd"}> : () -> ()
    %cst_26 = arith.constant dense<0.000000e+00> : vector<4x8x8xf32>
    %28 = tpu.matmul %16, %27, %cst_26 {dimension_numbers = #tpu.dot_dimension_numbers<[2], [1], [1], [2], [0, 0, 0, 1, 1, 2], [0], [0]>} : vector<4x8x8xf32>, vector<4x8x8xf32>, vector<4x8x8xf32> -> vector<4x8x8xf32>
    "tpu.trace_stop"() : () -> ()
    %29 = arith.addf %25, %28 : vector<4x8x8xf32>
    %c0_27 = arith.constant 0 : index
    %c0_28 = arith.constant 0 : index
    %c0_29 = arith.constant 0 : index
    %30 = vector.load %arg11[%c0_27, %c0_28, %c0_29] : memref<4x8x8xf32, #tpu.memory_space<vmem>>, vector<4x8x8xf32>
    tpu.vector_store %arg11[%c0_27, %c0_28, %c0_29], %29 {strides = array<i32>} : memref<4x8x8xf32, #tpu.memory_space<vmem>>, vector<4x8x8xf32>,
    %c0_30 = arith.constant 0 : index
    %c0_31 = arith.constant 0 : index
    %c0_32 = arith.constant 0 : index
    %31 = vector.load %arg9[%c0_30, %c0_31, %c0_32] : memref<4x8x1xf32, #tpu.memory_space<vmem>>, vector<4x8x1xf32>
    tpu.vector_store %arg9[%c0_30, %c0_31, %c0_32], %11 {strides = array<i32>} : memref<4x8x1xf32, #tpu.memory_space<vmem>>, vector<4x8x1xf32>,
    %c0_i32_33 = arith.constant 0 : i32
    %32 = arith.cmpi eq, %arg2, %c0_i32_33 : i32
    %33 = arith.extui %32 : i1 to i32
    %c0_i32_34 = arith.constant 0 : i32
    %34 = arith.cmpi ne, %33, %c0_i32_34 : i32
    scf.if %34 {
      %c0_35 = arith.constant 0 : index
      %c0_36 = arith.constant 0 : index
      %c0_37 = arith.constant 0 : index
      %35 = vector.load %arg10[%c0_35, %c0_36, %c0_37] : memref<4x8x1xf32, #tpu.memory_space<vmem>>, vector<4x8x1xf32>
      %36 = tpu.reciprocal %35 : vector<4x8x1xf32> -> vector<4x8x1xf32>
      %c0_38 = arith.constant 0 : index
      %c0_39 = arith.constant 0 : index
      %c0_40 = arith.constant 0 : index
      %37 = vector.load %arg11[%c0_38, %c0_39, %c0_40] : memref<4x8x8xf32, #tpu.memory_space<vmem>>, vector<4x8x8xf32>
      %38 = vector.broadcast %36 : vector<4x8x1xf32> to vector<4x8x8xf32>
      %39 = arith.mulf %37, %38 : vector<4x8x8xf32>
      %40 = vector.extract_strided_slice %39 {offsets = [0, 0, 0], sizes = [1, 8, 8], strides = [1, 1, 1]} : vector<4x8x8xf32> to vector<1x8x8xf32>
      %41 = vector.shape_cast %40 : vector<1x8x8xf32> to vector<8x8xf32>
      %42 = vector.extract_strided_slice %39 {offsets = [1, 0, 0], sizes = [1, 8, 8], strides = [1, 1, 1]} : vector<4x8x8xf32> to vector<1x8x8xf32>
      %43 = vector.shape_cast %42 : vector<1x8x8xf32> to vector<8x8xf32>
      %44 = vector.extract_strided_slice %39 {offsets = [2, 0, 0], sizes = [1, 8, 8], strides = [1, 1, 1]} : vector<4x8x8xf32> to vector<1x8x8xf32>
      %45 = vector.shape_cast %44 : vector<1x8x8xf32> to vector<8x8xf32>
      %46 = vector.extract_strided_slice %39 {offsets = [3, 0, 0], sizes = [1, 8, 8], strides = [1, 1, 1]} : vector<4x8x8xf32> to vector<1x8x8xf32>
      %47 = vector.shape_cast %46 : vector<1x8x8xf32> to vector<8x8xf32>
      %48 = tpu.concatenate %41, %43, %45, %47 in 1 : vector<8x8xf32>, vector<8x8xf32>, vector<8x8xf32>, vector<8x8xf32> -> vector<8x32xf32>
      %c0_41 = arith.constant 0 : index
      %c0_42 = arith.constant 0 : index
      %49 = vector.load %arg6[%c0_41, %c0_42] : memref<32x32xf32, #tpu.memory_space<vmem>>, vector<32x32xf32>
      %cst_43 = arith.constant dense<0.000000e+00> : vector<8x32xf32>
      %50 = tpu.matmul %48, %49, %cst_43 {dimension_numbers = #tpu.dot_dimension_numbers<[1], [0], [0], [1], [0, 0, 1, 1], [], []>} : vector<8x32xf32>, vector<32x32xf32>, vector<8x32xf32> -> vector<8x32xf32>
      %c0_44 = arith.constant 0 : index
      %c0_45 = arith.constant 0 : index
      %51 = vector.load %arg7[%c0_44, %c0_45] : memref<1x32xf32, #tpu.memory_space<vmem>>, vector<1x32xf32>
      %52 = vector.broadcast %51 : vector<1x32xf32> to vector<8x32xf32>
      %53 = arith.addf %50, %52 : vector<8x32xf32>
      %c0_46 = arith.constant 0 : index
      %c0_47 = arith.constant 0 : index
      %c0_48 = arith.constant 0 : index
      %54 = vector.load %arg8[%c0_46, %c0_47, %c0_48] : memref<1x8x32xf32, #tpu.memory_space<vmem>>, vector<1x8x32xf32>
      %55 = vector.shape_cast %54 : vector<1x8x32xf32> to vector<8x32xf32>
      %56 = vector.shape_cast %53 : vector<8x32xf32> to vector<1x8x32xf32>
      tpu.vector_store %arg8[%c0_46, %c0_47, %c0_48], %56 {strides = array<i32>} : memref<1x8x32xf32, #tpu.memory_space<vmem>>, vector<1x8x32xf32>,
    } else {
    }
    return
  }
  func.func @transform_0(%arg0: i32, %arg1: i32, %arg2: i32) -> (i32, i32, i32, i32) {
    %c0_i32 = arith.constant 0 : i32
    %c0_i32_0 = arith.constant 0 : i32
    %c0_i32_1 = arith.constant 0 : i32
    return %arg0, %c0_i32, %arg1, %c0_i32_0 : i32, i32, i32, i32
  }
  func.func @transform_1(%arg0: i32, %arg1: i32, %arg2: i32) -> (i32, i32, i32, i32) {
    %c0_i32 = arith.constant 0 : i32
    %c0_i32_0 = arith.constant 0 : i32
    %c0_i32_1 = arith.constant 0 : i32
    return %arg0, %c0_i32, %arg2, %c0_i32_0 : i32, i32, i32, i32
  }
  func.func @transform_2(%arg0: i32, %arg1: i32, %arg2: i32) -> (i32, i32, i32, i32) {
    %c0_i32 = arith.constant 0 : i32
    %c0_i32_0 = arith.constant 0 : i32
    %c0_i32_1 = arith.constant 0 : i32
    return %arg0, %c0_i32, %arg2, %c0_i32_0 : i32, i32, i32, i32
  }
  func.func @transform_3(%arg0: i32, %arg1: i32, %arg2: i32) -> (i32, i32) {
    %c0_i32 = arith.constant 0 : i32
    %c0_i32_0 = arith.constant 0 : i32
    %c0_i32_1 = arith.constant 0 : i32
    return %c0_i32, %c0_i32_0 : i32, i32
  }
  func.func @transform_4(%arg0: i32, %arg1: i32, %arg2: i32) -> (i32, i32) {
    %c0_i32 = arith.constant 0 : i32
    %c0_i32_0 = arith.constant 0 : i32
    %c0_i32_1 = arith.constant 0 : i32
    return %c0_i32, %c0_i32_0 : i32, i32
  }
  func.func @transform_5(%arg0: i32, %arg1: i32, %arg2: i32) -> (i32, i32, i32) {
    %c0_i32 = arith.constant 0 : i32
    %c0_i32_0 = arith.constant 0 : i32
    return %arg0, %arg1, %c0_i32 : i32, i32, i32
  }
}

</mosaic_0001>

<bundles_post_ra>
// kernel: tpu_custom_call.1
= control target key start
LH: loop header
LB: loop body
LE: loop exit
PB: predicated region body
PF: predicated region fallthrough
CT: control target
= control target key end

     0   :  { %s2349_s0 = inlined_call_operand.hbm [shape: f32[2,4,8,8], index: 0, kind: input, shape index: {}]   ;;  %s2350_s1 = inlined_call_operand.hbm [shape: f32[2,4,8,8], index: 1, kind: input, shape index: {}]   ;;  %s2351_s2 = inlined_call_operand.hbm [shape: f32[2,4,8,8], index: 2, kind: input, shape index: {}]   ;;  %s2352_s3 = inlined_call_operand.hbm [shape: f32[32,32], index: 3, kind: input, shape index: {}]   ;;  %s2353_s4 = inlined_call_operand.vmem [shape: f32[1,32], index: 4, kind: input, shape index: {}]   ;;  %s2354_s5 = inlined_call_operand.hbm [shape: f32[2,8,32], index: 5, kind: output, shape index: {}]  }
   0x1   :  { %2374 = sst [smem:[#allocation23_spill]] %s2349_s0 }
   0x2   :  { %2375 = sst [smem:[#allocation24_spill]] %s2350_s1 }
   0x3   :  { %10 = vsyncpa [#allocation6], 0 }
   0x4   :  { %12 = vsyncpa [#allocation6 + $0x1], 0 }
   0x5   :  { %13 = vsyncpa [#allocation9], 0 }
   0x6   :  { %15 = vsyncpa [#allocation9 + $0x1], 0 }
   0x7   :  { %16 = vsyncpa [#allocation12], 0 }
   0x8   :  { %17 = vsyncpa [#allocation7], 0 }
   0x9   :  { %19 = vsyncpa [#allocation7 + $0x1], 0  ;;  %s1916_s18 = smov 0   ;;  %s1918_s19 = smov 0  }
   0xa   :  { %s1920_s20 = smov 0   ;;  %s1922_s21 = smov 0  }
   0xb   :  { %s1924_s22 = smov 0   ;;  %s1926_s23 = smov 0  }
   0xc LB: > { %2376 = sst [smem:[#allocation18_spill]] %s1857_s20  ;;  %s44_s24 = sadd.s32 1, %s1865_s22  ;;  %s1869_s23 = sphi %s1926_s23, %s25_s23   ;;  %s1865_s22 = sphi %s1924_s22, %s2408_s22   ;;  %s1861_s21 = sphi %s1922_s21, %s2407_s21   ;;  %s1857_s20 = sphi %s1920_s20, %s2406_s20   ;;  %s1853_s19 = sphi %s1918_s19, %s2410_s19   ;;  %s1849_s18 = sphi %s1916_s18, %s2409_s18  }
   0xd   : > { %2377 = sst [smem:[#allocation19_spill]] %s1865_s22  ;;  %s53_s25 = sadd.s32 1, %s1857_s20 }
   0xe   : > { %2378 = sst [smem:[#allocation20_spill]] %s1869_s23  ;;  %p46_p0 = scmp.ge.s32.totalorder %s44_s24, 2 }
   0xf   : > { %p2355_p1 = scmp.ne.s32.totalorder %s1857_s20, %s1853_s19  ;;  %p61_p2 = scmp.eq.s32.totalorder %s1869_s23, 0 }
  0x10   : > { %s2412_s24 = smov (%p46_p0, %s44_s24), 0  ;;  %p1573_p6 = scmp.lt.s32.totalorder %s1869_s23, 2 }
  0x11   : > { %2379 = sst [smem:[#allocation21_spill]] %s2412_s24  ;;  %p62_p3 = por %p61_p2, %p2355_p1 }
  0x12   : > { %s48_s26 = ssub.s32 %s1865_s22, %s2412_s24  ;;  %s2360_s27 = sand.u32 1, %s1857_s20  }
  0x13   : > { %p51_p5 = scmp.eq.s32.totalorder %s48_s26, 0  ;;  %s1962_s28 = sshll.u32 %s1865_s22, 9 }
  0x14   : > { %s1969_s30 = sshll.u32 %s2360_s27, 5  ;;  %p1971_p7 = pnand %p1573_p6, %p62_p3 }
  0x15   : > { %s1965_s29 = scalar_select %p51_p5, %s1857_s20, %s53_s25  }
  0x16   : > { %s2381_s6 = scalar_select %p1971_p7, 1, 0 }
  0x17   : > { %2380 = sst [smem:[#allocation22_spill]] %s1965_s29  ;;  %s254_s7 = sand.u32 1, %s1869_s23  }
  0x18   : > { %s2382_s1 = sld [smem:[#allocation24_spill]]  ;;  %s258_s11 = scalar_lea.vmem [#allocation8], %s1969_s30 }
  0x19   : > { %s266_s12 = sshll.u32 %s258_s11, 4  ;;  %s1985_s13 = scalar_lea.sflag [#allocation9], %s254_s7  ;;  %s1983_s12 = int_to_ptr.vmem [resolvable:$true] %s266_s12 }
  0x1a   : > { %p1991_p9 = pneg %p1971_p7 }
  0x1c   : > { %s2383_s15 = scalar_select %p1991_p9, 1, 0 }
  0x1e   : > { %s1980_s10 = scalar_lea.hbm %s2382_s1, %s1962_s28  ;;  %s1666_s25 = scalar_lea.hbm %s2382_s1, 1024 }
  0x1f   : > { %s1661_s14 = scalar_lea.hbm %s1980_s10, 512  ;;  %p1667_p12 = scmp.lt.u32.totalorder %s1980_s10, %s2382_s1 }
  0x20   : > { %p1662_p8 = scmp.ne.s32.totalorder %s1980_s10, %s1661_s14  ;;  %p1668_p13 = scmp.lt.u32.totalorder %s1666_s25, %s1661_s14 }
  0x21   : > { %p1670_p2 = scmp.lt.u32.totalorder %s1661_s14, %s1980_s10 }
  0x22   : > { %p1664_p10 = pnand %p1991_p9, %p1662_p8  ;;  %p1669_p0 = por %p1668_p13, %p1667_p12 }
  0x24   : > { %p1665_p11 = pneg %p1664_p10  ;;  %p1671_p3 = por %p1670_p2, %p1669_p0 }
  0x26   : > { %p1672_p5 = pnand %p1671_p3, %p1665_p11 }
  0x28   : > { %1675 = shalt.err (!%p1672_p5)
}
  0x29   : > { %s1676_s7 = scalar_lea.vmem %s1983_s12, 512  ;;  %s1871_s9 = smov [#allocation8]  }
  0x2a   : > { %p1677_p6 = scmp.ne.s32.totalorder %s1983_s12, %s1676_s7  ;;  %s1681_s11 = sshll.u32 %s1871_s9, 4  ;;  %s1682_s11 = int_to_ptr.vmem [resolvable:$false] %s1681_s11 }
  0x2b   : > { %s1683_s16 = scalar_lea.vmem %s1682_s11, 1024  ;;  %p1684_p4 = scmp.lt.s32.totalorder %s1983_s12, %s1682_s11 }
  0x2c   : > { %p1679_p8 = pnand %p1677_p6, %p1991_p9  ;;  %p1685_p1 = scmp.lt.s32.totalorder %s1683_s16, %s1676_s7 }
  0x2e   : > { %p1680_p10 = pneg %p1679_p8  ;;  %p1686_p12 = por %p1685_p1, %p1684_p4 }
  0x30   : > { %p1687_p13 = pnand %p1686_p12, %p1680_p10 }
  0x32   : > { %1690 = shalt.err (!%p1687_p13)
}
  0x33   : > { %s2356_s14 = smov 128   ;;  %s2358_s17 = smov 8  }
  0x34   : > { %1564 = dma.hbm_to_vmem [thread:$0]  (!%p1971_p7), %s1980_s10, 512, %s1983_s12, %s1985_s13, %s2356_s14, %s2356_s14, %s2358_s17  }
  0x35   : > { %s2019_s25 = sadd.s32 4294967295, %s1869_s23   ;;  %s1424_s26 = sadd.s32 4294967294, %s1869_s23  }
  0x36   : > { %p66_p1 = scmp.ne.s32.totalorder %s1853_s19, %s1849_s18  ;;  %p2365_p4 = scmp.eq.s32.totalorder %s2019_s25, 0 }
  0x37   : > { %p190_p11 = scmp.eq.s32.totalorder %s2019_s25, 1  ;;  %p196_p0 = scmp.eq.s32.totalorder %s1424_s26, 1 }
  0x38   : > { %p1425_p2 = scmp.ge.s32.totalorder %s1869_s23, 1  ;;  %p2029_p3 = por %p2365_p4, %p66_p1 }
  0x39   : > { %p2385_p5 = scmp.ne.s32.totalorder %s1857_s20, %s1853_s19  ;;  %p2040_p8 = por %p196_p0, %p66_p1 }
  0x3a   : > { %s2384_s8 = scalar_select %p2029_p3, 1, 0 }
  0x3b   : > { %p2036_p6 = por %p190_p11, %p2385_p5  ;;  %p203_p10 = scmp.lt.s32.totalorder %s1869_s23, 3 }
  0x3c   : > { %s2387_s12 = scalar_select %p2040_p8, 1, 0 }
  0x3d   : > { %s2386_s10 = scalar_select %p2036_p6, 1, 0 }
  0x3e   : > { %p2045_p12 = pnand %p1425_p2, %p203_p10  ;;  %s1874_s9 = smov [#allocation11]  }
  0x3f   : > { %s215_s11 = sshll.u32 %s1874_s9, 4  ;;  %s2389_s0 = sld [smem:[#allocation23_spill]]  ;;  %s2049_s11 = int_to_ptr.vmem [resolvable:$true] %s215_s11 }
  0x40   : > { %s2388_s7 = scalar_select %p2045_p12, 1, 0 }
  0x41   : > { %p1554_p13 = pneg %p2045_p12  ;;  %s236_s17 = scalar_lea.vmem [#allocation5], %s1969_s30 }
  0x42   : > { %s244_s27 = sshll.u32 %s236_s17, 4  ;;  %s2391_s9 = sand.u32 1, %s1857_s20   ;;  %s2066_s27 = int_to_ptr.vmem [resolvable:$true] %s244_s27 }
  0x43   : > { %p2062_p1 = pnand %p1554_p13, %p2365_p4  ;;  %s2070_s24 = scalar_lea.sflag [#allocation6], %s2391_s9 }
  0x45   : > { %s2057_s14 = scalar_lea.hbm %s2389_s0, %s1962_s28  ;;  %s1696_s29 = scalar_lea.hbm %s2389_s0, 1024 }
  0x46   : > { %s2390_s1 = scalar_select %p2062_p1, 1, 0 }
  0x47   : > { %s1691_s22 = scalar_lea.hbm %s2057_s14, 512  ;;  %p1697_p5 = scmp.lt.u32.totalorder %s2057_s14, %s2389_s0 }
  0x48   : > { %p1692_p11 = scmp.ne.s32.totalorder %s2057_s14, %s1691_s22  ;;  %p1698_p10 = scmp.lt.u32.totalorder %s1696_s29, %s1691_s22 }
  0x49   : > { %p1700_p4 = scmp.lt.u32.totalorder %s1691_s22, %s2057_s14 }
  0x4a   : > { %p1694_p0 = pnand %p1692_p11, %p1991_p9  ;;  %p1699_p13 = por %p1698_p10, %p1697_p5 }
  0x4c   : > { %p1695_p2 = pneg %p1694_p0  ;;  %p1701_p8 = por %p1700_p4, %p1699_p13 }
  0x4e   : > { %p1702_p6 = pnand %p1701_p8, %p1695_p2 }
  0x50   : > { %1705 = shalt.err (!%p1702_p6)
}
  0x51   : > { %s1706_s9 = scalar_lea.vmem %s2066_s27, 512  ;;  %s1875_s16 = smov [#allocation5]  }
  0x52   : > { %p1707_p11 = scmp.ne.s32.totalorder %s2066_s27, %s1706_s9  ;;  %s1711_s26 = sshll.u32 %s1875_s16, 4  ;;  %s1712_s26 = int_to_ptr.vmem [resolvable:$false] %s1711_s26 }
  0x53   : > { %s1713_s23 = scalar_lea.vmem %s1712_s26, 1024  ;;  %p1714_p12 = scmp.lt.s32.totalorder %s2066_s27, %s1712_s26 }
  0x54   : > { %p1709_p0 = pnand %p1707_p11, %p1991_p9  ;;  %p1715_p1 = scmp.lt.s32.totalorder %s1713_s23, %s1706_s9 }
  0x56   : > { %p1710_p3 = pneg %p1709_p0  ;;  %p1716_p5 = por %p1715_p1, %p1714_p12 }
  0x58   : > { %p1717_p10 = pnand %p1716_p5, %p1710_p3 }
  0x5a   : > { %1720 = shalt.err (!%p1717_p10)
}
  0x5b   : > { %s2392_s22 = smov 8   ;;  %s2393_s29 = smov 128  }
  0x5c   : > { %1561 = dma.hbm_to_vmem [thread:$0]  (!%p1971_p7), %s2057_s14, 512, %s2066_s27, %s2070_s24, %s2393_s29, %s2393_s29, %s2392_s22  }
  0x5d   : > { %s1721_s16 = scalar_lea.hbm %s2352_s3, 512  ;;  %p2394_p3 = scmp.ne.s32.totalorder %s2390_s1, 0 }
  0x5e   : > { %p1722_p4 = scmp.ne.s32.totalorder %s2352_s3, %s1721_s16  ;;  %p1728_p1 = scmp.lt.u32.totalorder %s1721_s16, %s2352_s3 }
  0x5f   : > { %p1723_p6 = pneg %p2394_p3 }
  0x61   : > { %p1724_p8 = pnand %p1723_p6, %p1722_p4 }
  0x63   : > { %p1725_p12 = pneg %p1724_p8 }
  0x65   : > { %p1730_p2 = pnand %p1728_p1, %p1725_p12 }
  0x67   : > { %1733 = shalt.err (!%p1730_p2)
}
  0x68   : > { %s1734_s24 = scalar_lea.vmem %s2049_s11, 512  ;;  %p1742_p5 = scmp.lt.s32.totalorder %s2049_s11, %s2049_s11 }
  0x69   : > { %p1735_p13 = scmp.ne.s32.totalorder %s2049_s11, %s1734_s24  ;;  %p1743_p10 = scmp.lt.s32.totalorder %s1734_s24, %s1734_s24 }
  0x6b   : > { %p1737_p11 = pnand %p1735_p13, %p1723_p6  ;;  %p1744_p7 = por %p1743_p10, %p1742_p5 }
  0x6d   : > { %p1738_p0 = pneg %p1737_p11 }
  0x6f   : > { %p1745_p9 = pnand %p1744_p7, %p1738_p0 }
  0x71   : > { %1748 = shalt.err (!%p1745_p9)
}
  0x72   : > { %1557 = dma.hbm_to_vmem [thread:$0]  (!%p2394_p3), %s2352_s3, 512, %s2049_s11, [#allocation12], %s2393_s29, %s2393_s29, %s2392_s22  }
  0x73   : > { %s2125_s17 = scalar_lea.hbm %s2351_s2, %s1962_s28  ;;  %s280_s1 = scalar_lea.vmem [#allocation10], %s1969_s30 }
  0x74   : > { %s288_s16 = sshll.u32 %s280_s1, 4  ;;  %s1749_s26 = scalar_lea.hbm %s2125_s17, 512  ;;  %s2128_s16 = int_to_ptr.vmem [resolvable:$true] %s288_s16 }
  0x75   : > { %p1750_p7 = scmp.ne.s32.totalorder %s2125_s17, %s1749_s26  ;;  %p2395_p9 = scmp.ne.s32.totalorder %s2383_s15, 0 }
  0x76   : > { %s1754_s23 = scalar_lea.hbm %s2351_s2, 1024  ;;  %p1755_p3 = scmp.lt.u32.totalorder %s2125_s17, %s2351_s2 }
  0x77   : > { %p1752_p4 = pnand %p1750_p7, %p2395_p9  ;;  %p1756_p8 = scmp.lt.u32.totalorder %s1754_s23, %s1749_s26 }
  0x78   : > { %p1758_p1 = scmp.lt.u32.totalorder %s1749_s26, %s2125_s17 }
  0x79   : > { %p1753_p6 = pneg %p1752_p4  ;;  %p1757_p12 = por %p1756_p8, %p1755_p3 }
  0x7b   : > { %p1759_p2 = por %p1758_p1, %p1757_p12 }
  0x7d   : > { %p1760_p13 = pnand %p1759_p2, %p1753_p6 }
  0x7f   : > { %1763 = shalt.err (!%p1760_p13)
}
  0x80   : > { %s1764_s30 = scalar_lea.vmem %s2128_s16, 512  ;;  %s1876_s0 = smov [#allocation10]  }
  0x81   : > { %p1765_p11 = scmp.ne.s32.totalorder %s2128_s16, %s1764_s30  ;;  %s1769_s20 = sshll.u32 %s1876_s0, 4  ;;  %s1770_s20 = int_to_ptr.vmem [resolvable:$false] %s1769_s20 }
  0x82   : > { %s1771_s27 = scalar_lea.vmem %s1770_s20, 1024  ;;  %p1772_p10 = scmp.lt.s32.totalorder %s2128_s16, %s1770_s20 }
  0x83   : > { %p1767_p0 = pnand %p1765_p11, %p2395_p9  ;;  %p1773_p7 = scmp.lt.s32.totalorder %s1771_s27, %s1764_s30 }
  0x85   : > { %p1768_p5 = pneg %p1767_p0  ;;  %p1774_p4 = por %p1773_p7, %p1772_p10 }
  0x87   : > { %p1775_p3 = pnand %p1774_p4, %p1768_p5 }
  0x89   : > { %1778 = shalt.err (!%p1775_p3)
}
  0x8a   : > { %p2396_p6 = scmp.ne.s32.totalorder %s2381_s6, 0  ;;  %p2397_p9 = scmp.ne.s32.totalorder %s2388_s7, 0 }
  0x8b   : > { %s2158_s15 = sand.u32 (!%p2397_p9), 1, %s1853_s19   ;;  %p2398_p8 = scmp.ne.s32.totalorder (!%p2397_p9), %s2384_s8, 0 }
  0x8c   : > { %1567 = dma.hbm_to_vmem [thread:$0]  (!%p2396_p6), %s2125_s17, 512, %s2128_s16, %s1985_s13, %s2393_s29, %s2393_s29, %s2392_s22  }
  0x8d   : > { %300 = sbr.rel (%p2397_p9) target bundleno = 1308 (0x51c), region = 40  ;;  %s1438_s14 = sshll.u32 (!%p2397_p9), %s2158_s15, 5 }
  0x8e   : > { %s303_s1 = scalar_lea.sflag (!%p2397_p9), [#allocation6], %s2158_s15  ;;  %s2162_s26 = scalar_lea.vmem (!%p2397_p9), [#allocation5], %s1438_s14 }
  0x94   : > { %1832 = dma.done.wait (%p2398_p8), %s303_s1, 512  }
  0x95   : > { %1834 = vsyncadd (%p2398_p8), %s303_s1, 4294966784  ;;  %s311_s6 = sand.u32 1, %s2019_s25   ;;  %s2169_s7 = scalar_lea.vmem [#allocation8], %s1438_s14 }
  0x96   : > { %s312_s13 = scalar_lea.sflag [#allocation9], %s311_s6 }
  0x97   : > { %1836 = dma.done.wait (%p2398_p8), %s312_s13, 1024  }
  0x98   : > { %1838 = vsyncadd (%p2398_p8), %s312_s13, 4294966272  ;;  %s2175_s22 = scalar_lea.vmem [#allocation10], %s1438_s14  ;;  %p2399_p12 = scmp.eq.s32.totalorder %s2019_s25, 0 }
  0x9a   : > { %1840 = dma.done.wait (%p2399_p12), [#allocation12], 512   ;;  %p2400_p1 = pmov %p2399_p12 }
  0x9b   : > { %vm378_vm0 = vcmask 64512   ;;  %v1877_v0 = vmov 0.0   ;;  %vm1878_vm1 = vmmov 0   ;;  %v387_v1 = vld [vmem:[%s2169_s7] sm:$0xff]  ;;  %v389_v2 = vld [vmem:[%s2169_s7 + $0x10] sm:$0xff]  ;;  %v388_v5 = vld [vmem:[%s2169_s7 + $0x8] sm:$0xff] }
  0x9c   : > { %1842 = vsyncadd (%p2400_p1), [#allocation12], 4294966784  ;;  %1485 = vmatprep.subr.mxu1 %v1877_v0  ;;  %1495 = vmatprep.subr.mxu0 %v1877_v0  ;;  %379 = vst.msk [vmem:[#allocation4] sm:$0xff] %vm378_vm0, %v1877_v0  ;;  %v383_v3 = vld [vmem:[%s2162_s26] sm:$0xff]  ;;  %v385_v4 = vld [vmem:[%s2162_s26 + $0x10] sm:$0xff]  ;;  %vm369_vm2 = vcmask 7168  }
  0x9d   : > { %380 = vst.msk [vmem:[#allocation4 + $0x8] sm:$0xff] %vm378_vm0, %v1877_v0  ;;  %381 = vst.msk [vmem:[#allocation4 + $0x10] sm:$0xff] %vm378_vm0, %v1877_v0  ;;  %1487 = vmatprep.mubr.msk.f32.mxu1 %vm1878_vm1, %v1877_v0  ;;  %1497 = vmatprep.mubr.msk.f32.mxu0 %vm1878_vm1, %v1877_v0  ;;  %v384_v6 = vld [vmem:[%s2162_s26 + $0x8] sm:$0xff]  ;;  %v390_v7 = vld [vmem:[%s2169_s7 + $0x18] sm:$0xff]  ;;  %v1879_v9 = vmov -inf   ;;  %v1880_v22 = vmov 0  }
  0x9e   : > { %382 = vst.msk [vmem:[#allocation4 + $0x18] sm:$0xff] %vm378_vm0, %v1877_v0  ;;  %1486 = vmatpush3.xpose.msk.msra.mxu1 %vm378_vm0, %v387_v1  ;;  %1496 = vmatpush3.xpose.msk.msra.mxu0 %vm378_vm0, %v389_v2  ;;  %v386_v8 = vld [vmem:[%s2162_s26 + $0x18] sm:$0xff]  ;;  %v817_v39 = vld [vmem:[%s2175_s22] sm:$0xff]  ;;  %v818_v40 = vld [vmem:[%s2175_s22 + $0x8] sm:$0xff]  ;;  %s1882_s25 = smov 8   ;;  %s1883_s8 = smov 24  }
  0x9f   : > { %1490 = vmatprep.subr.mxu1 %v1877_v0  ;;  %1505 = vmatprep.subr.mxu0 %v1877_v0  ;;  %372 = vst.msk [vmem:[#allocation2 + $0x10] sm:$0xff] %vm369_vm2, %v1879_v9  ;;  %370 = vst.msk [vmem:[#allocation2] sm:$0xff] %vm369_vm2, %v1879_v9  ;;  %v819_v54 = vld [vmem:[%s2175_s22 + $0x10] sm:$0xff]  ;;  %v820_v58 = vld [vmem:[%s2175_s22 + $0x18] sm:$0xff]  ;;  %s1884_s29 = smov 16   ;;  %vm1177_vm3 = vcmask 130048  }
  0xa0   : > { %371 = vst.msk [vmem:[#allocation2 + $0x8] sm:$0xff] %vm369_vm2, %v1879_v9  ;;  %373 = vst.msk [vmem:[#allocation2 + $0x18] sm:$0xff] %vm369_vm2, %v1879_v9  ;;  %1636 = vset.pattern.permute.xlu1 %v1880_v22  ;;  %1635 = vset.pattern.permute.xlu0 %v1880_v22  ;;  %vm1179_vm4 = vcmask 195584   ;;  %vm1192_vm5 = vcmask 261120   ;;  %s1442_s17 = sshll.u32 %s2158_s15, 3  ;;  %s1458_s11 = sshll.u32 %s1861_s21, 7 }
  0xa1   : > { %1488 = vmatmul.mubr.msk.f32.vlgmr.msra.gmra.mrb[0].mxu1 %vm378_vm0, %v383_v3  ;;  %1498 = vmatmul.mubr.msk.f32.vlgmr.msra.gmra.mrb[0].mxu0 %vm378_vm0, %v385_v4  ;;  %374 = vst.msk [vmem:[#allocation3] sm:$0xff] %vm369_vm2, %v1877_v0  ;;  %375 = vst.msk [vmem:[#allocation3 + $0x8] sm:$0xff] %vm369_vm2, %v1877_v0  ;;  %s364_s23 = scalar_lea.vmem [#allocation13], %s1442_s17  ;;  %s2300_s0 = scalar_lea.hbm %s2354_s5, %s1458_s11 }
  0xa2   : > { %1491 = vmatpush3.xpose.msk.msra.mxu1 %vm378_vm0, %v388_v5  ;;  %1492 = vmatprep.mubr.msk.f32.mxu1 %vm1878_vm1, %v1877_v0  ;;  %376 = vst.msk [vmem:[#allocation3 + $0x10] sm:$0xff] %vm369_vm2, %v1877_v0  ;;  %377 = vst.msk [vmem:[#allocation3 + $0x18] sm:$0xff] %vm369_vm2, %v1877_v0  ;;  %s1282_s24 = sshll.u32 %s364_s23, 4  ;;  %s1268_s20 = scalar_lea.sflag [#allocation7], %s2158_s15  ;;  %s2302_s24 = int_to_ptr.vmem [resolvable:$true] %s1282_s24 }
  0xa3   : > { %1500 = vmatprep.subr.mxu1 %v1877_v0  ;;  %1507 = vmatprep.mubr.msk.f32.mxu0 %vm1878_vm1, %v1877_v0  ;;  %s1779_s27 = scalar_lea.vmem %s2302_s24, 128  ;;  %p2401_p13 = scmp.ne.s32.totalorder %s2386_s10, 0 }
  0xa4   : > { %1506 = vmatpush3.msra.mxu0 %v817_v39  ;;  %p1780_p2 = scmp.ne.s32.totalorder %s2302_s24, %s1779_s27  ;;  %s1885_s21 = smov [#allocation13]  }
  0xa5   : > { %1493 = vmatmul.mubr.msk.f32.vlgmr.msra.gmra.mrb[2].mxu1 %vm378_vm0, %v384_v6  ;;  %1515 = vmatprep.subr.mxu0 %v1877_v0  ;;  %s1783_s14 = sshll.u32 %s1885_s21, 4  ;;  %s1784_s14 = int_to_ptr.vmem [resolvable:$false] %s1783_s14 }
  0xa6   : > { %1501 = vmatpush3.xpose.msk.msra.mxu1 %vm378_vm0, %v390_v7  ;;  %1502 = vmatprep.mubr.msk.f32.mxu1 %vm1878_vm1, %v1877_v0  ;;  %v2239_v23 = vld [vmem:[#allocation2 + $0x10] sm:$0xff]  ;;  %v2241_v24 = vld [vmem:[#allocation2] sm:$0xff]  ;;  %p1781_p11 = pnand %p1780_p2, %p2401_p13  ;;  %s1785_s1 = scalar_lea.vmem %s1784_s14, 256 }
  0xa7   : > { %1510 = vmatprep.subr.mxu1 %v1877_v0  ;;  %v2247_v29 = vld [vmem:[#allocation2 + $0x8] sm:$0xff]  ;;  %v699_v34 = vld [vmem:[#allocation2 + $0x18] sm:$0xff]  ;;  %p1786_p5 = scmp.lt.s32.totalorder %s2302_s24, %s1784_s14  ;;  %p1787_p10 = scmp.lt.s32.totalorder %s1785_s1, %s1779_s27 }
  0xa8   : > { %v761_v9 = vld [vmem:[#allocation3 + $0x8] sm:$0xff]  ;;  %p1782_p0 = pneg %p1781_p11 }
  0xa9   : > { %1503 = vmatmul.mubr.msk.f32.vlgmr.msra.gmra.mrb[4].mxu1 %vm378_vm0, %v386_v8  ;;  %v762_v6 = vld [vmem:[#allocation3 + $0x10] sm:$0xff]  ;;  %p1788_p7 = por %p1787_p10, %p1786_p5 }
  0xaa   : > { %1512 = vmatprep.mubr.msk.f32.mxu1 %vm1878_vm1, %v1877_v0  ;;  %1511 = vmatpush3.msra.mxu1 %v818_v40 }
  0xab   : > { %1520 = vmatprep.subr.mxu1 %v1877_v0  ;;  %p1789_p4 = pnand %p1788_p7, %p1782_p0 }
 0x174   : > { %v464_v10 = vpop.f32.mrb[0].mxu1  ;;  %v616_v11 = vpop.f32.mrb[0].mxu0 }
 0x175   : > { %v1489_v12 = vpop.f32.mrb[1].mxu1  ;;  %v1499_v13 = vpop.f32.mrb[1].mxu0  ;;  %v706_v14 = vsel %vm378_vm0, %v616_v11, -inf  ;;  %v700_v15 = vsel %vm378_vm0, %v464_v10, -inf }
 0x176   : > { %707 = vmax.xlane.f32.xlu1 %v706_v14  ;;  %701 = vmax.xlane.f32.xlu0 %v700_v15  ;;  %v763_v13 = vld [vmem:[#allocation3 + $0x18] sm:$0xff] }
 0x178   : > { %v540_v16 = vpop.f32.mrb[2].mxu1 }
 0x179   : > { %v1494_v17 = vpop.f32.mrb[3].mxu1  ;;  %v703_v18 = vsel %vm378_vm0, %v540_v16, -inf }
 0x17a   : > { %704 = vmax.xlane.f32.xlu0 %v703_v18  ;;  %v760_v18 = vld [vmem:[#allocation3] sm:$0xff] }
 0x17c   : > { %v692_v19 = vpop.f32.mrb[4].mxu1 }
 0x17d   : > { %v709_v20 = vsel %vm378_vm0, %v692_v19, -inf  ;;  %v1504_v21 = vpop.f32.mrb[5].mxu1 }
 0x17e   : > { %710 = vmax.xlane.f32.xlu1 %v709_v20 }
 0x203   : > { %v708_v25 = vpop.xlane.xlu1 %707  ;;  %v702_v26 = vpop.xlane.xlu0 %701 }
 0x204   : > { %v714_v27 = vmax.f32 %v2239_v23, %v708_v25  ;;  %v2245_v28 = vmax.f32 %v2241_v24, %v702_v26 }
 0x206   : > { %v718_v30 = vsub.f32 %v2239_v23, %v714_v27  ;;  %1123 = vst.msk [vmem:[#allocation2 + $0x10] sm:$0xff] %vm369_vm2, %v714_v27  ;;  %v716_v31 = vsub.f32 %v2241_v24, %v2245_v28  ;;  %1121 = vst.msk [vmem:[#allocation2] sm:$0xff] %vm369_vm2, %v2245_v28  ;;  %740 = vperm.xlu1 %1636, %v714_v27   ;;  %730 = vperm.xlu0 %1635, %v2245_v28  }
 0x207   : > { %v705_v32 = vpop.xlane.xlu0 %704 }
 0x208   : > { %v713_v33 = vmax.f32 %v2247_v29, %v705_v32  ;;  %v724_v61 = vmul.f32 1.442695, %v718_v30  ;;  %v1182_v32 = vld [vmem:[#allocation11 + $0x8] sm:$0xff] }
 0x20a   : > { %v717_v35 = vsub.f32 %v2247_v29, %v713_v33  ;;  %1122 = vst.msk [vmem:[#allocation2 + $0x8] sm:$0xff] %vm369_vm2, %v713_v33  ;;  %735 = vperm.xlu1 %1636, %v713_v33   ;;  %v1881_v33 = vmov 0.0|0.0  }
 0x20b   : > { %v711_v36 = vpop.xlane.xlu1 %710 }
 0x20c   : > { %v715_v37 = vmax.f32 %v699_v34, %v711_v36  ;;  %v722_v1 = vmul.f32 1.442695, %v717_v35  ;;  %v790_v36 = vld [vmem:[#allocation4 + $0x8] sm:$0xff] }
 0x20e   : > { %v719_v38 = vsub.f32 %v699_v34, %v715_v37  ;;  %1124 = vst.msk [vmem:[#allocation2 + $0x18] sm:$0xff] %vm369_vm2, %v715_v37  ;;  %745 = vperm.xlu1 %1636, %v715_v37   ;;  %v791_v37 = vld [vmem:[#allocation4 + $0x10] sm:$0xff] }
 0x210   : > { %v726_v2 = vmul.f32 1.442695, %v719_v38 }
 0x285   : > { %v741_v41 = vpop.permute.xlu1 %740  ;;  %v731_v42 = vpop.permute.xlu0 %730 }
 0x286   : > { %v750_v43 = vsub.f32 %v616_v11, %v741_v41  ;;  %v748_v44 = vsub.f32 %v464_v10, %v731_v42 }
 0x288   : > { %v756_v45 = vmul.f32 1.442695, %v750_v43  ;;  %v752_v46 = vmul.f32 1.442695, %v748_v44  ;;  %v792_v43 = vld [vmem:[#allocation4 + $0x18] sm:$0xff] }
 0x289   : > { %v736_v47 = vpop.permute.xlu1 %735 }
 0x28a   : > { %1637 = vpow2.f32 %v756_v45  ;;  %v749_v48 = vsub.f32 %v540_v16, %v736_v47 }
 0x28b   : > { %1639 = vpow2.f32 %v752_v46 }
 0x28c   : > { %v754_v49 = vmul.f32 1.442695, %v749_v48 }
 0x28d   : > { %v746_v50 = vpop.permute.xlu1 %745 }
 0x28e   : > { %1641 = vpow2.f32 %v754_v49  ;;  %v751_v51 = vsub.f32 %v692_v19, %v746_v50 }
 0x290   : > { %v758_v52 = vmul.f32 1.442695, %v751_v51 }
 0x292   : > { %1643 = vpow2.f32 %v758_v52 }
 0x293   : > { %1645 = vpow2.f32 %v724_v61 }
 0x294   : > { %v1638_v53 = vpop.eup %1637  ;;  %1647 = vpow2.f32 %v722_v1 }
 0x295   : > { %v1640_v55 = vpop.eup %1639  ;;  %v774_v56 = vsel %vm378_vm0, %v1638_v53, 0.0  ;;  %1649 = vpow2.f32 %v726_v2 }
 0x296   : > { %1508 = vmatmul.mubr.msk.f32.vlgmr.msra.gmra.mrb[2].mxu0 %vm378_vm0, %v1640_v55  ;;  %775 = vadd.xlane.f32.xlu0 %v774_v56  ;;  %v768_v63 = vsel %vm378_vm0, %v1640_v55, 0.0  ;;  %v1183_v55 = vld [vmem:[#allocation11 + $0x10] sm:$0xff]  ;;  %v1184_v56 = vld [vmem:[#allocation11 + $0x18] sm:$0xff] }
 0x297   : > { %1516 = vmatpush3.msra.mxu0 %v819_v54  ;;  %1517 = vmatprep.mubr.msk.f32.mxu0 %vm1878_vm1, %v1877_v0 }
 0x298   : > { %v1642_v57 = vpop.eup %1641  ;;  %1536 = vmatprep.subr.bf16.mxu0 %v1881_v33 }
 0x299   : > { %1513 = vmatmul.mubr.msk.f32.vlgmr.msra.gmra.mrb[6].mxu1 %vm378_vm0, %v1642_v57  ;;  %v771_v59 = vsel %vm378_vm0, %v1642_v57, 0.0  ;;  %v1540_v57 = vpack.c.bf16 %v1184_v56, %v1183_v55 }
 0x29a   : > { %1518 = vmatmul.mubr.msk.f32.vlgmr.msra.gmra.mrb[4].mxu0 %vm378_vm0, %v1638_v53  ;;  %772 = vadd.xlane.f32.xlu1 %v771_v59 }
 0x29b   : > { %1521 = vmatpush3.msra.mxu1 %v820_v58  ;;  %1522 = vmatprep.mubr.msk.f32.mxu1 %vm1878_vm1, %v1877_v0 }
 0x29c   : > { %v1644_v60 = vpop.eup %1643  ;;  %1533 = vmatprep.mubr.msk.f32.mxu0 %vm1878_vm1, %v1877_v0  ;;  %v720_v0 = vmul.f32 1.442695, %v716_v31  ;;  %v1181_v31 = vld [vmem:[#allocation11] sm:$0xff] }
 0x29d   : > { %1523 = vmatmul.mubr.msk.f32.vlgmr.msra.gmra.mrb[8].mxu1 %vm378_vm0, %v1644_v60  ;;  %v777_v62 = vsel %vm378_vm0, %v1644_v60, 0.0  ;;  %v1646_v3 = vpop.eup %1645  ;;  %v1537_v34 = vpack.c.bf16 %v1182_v32, %v1181_v31 }
 0x29e   : > { %778 = vadd.xlane.f32.xlu1 %v777_v62  ;;  %v1648_v4 = vpop.eup %1647  ;;  %1651 = vpow2.f32 %v720_v0  ;;  %v766_v7 = vmul.f32 %v1646_v3, %v762_v6 }
 0x29f   : > { %v1650_v5 = vpop.eup %1649  ;;  %v765_v11 = vmul.f32 %v1648_v4, %v761_v9  ;;  %1538 = vmatpush3.bf16.msra.mxu0 %v1537_v34 }
 0x2a0   : > { %v767_v15 = vmul.f32 %v1650_v5, %v763_v13  ;;  %1539 = vmatprep.subr.bf16.mxu0 %v1881_v33 }
 0x2a2   : > { %769 = vadd.xlane.f32.xlu1 %v768_v63 }
 0x2a3   : > { %1541 = vmatpush3.bf16.msra.mxu0 %v1540_v57 }
 0x2a8   : > { %v1652_v16 = vpop.eup %1651 }
 0x2a9   : > { %v764_v20 = vmul.f32 %v1652_v16, %v760_v18 }
 0x2ac   : > { %805 = vperm.xlu0 %1635, %v1646_v3  }
 0x2b3   : > { %800 = vperm.xlu1 %1636, %v1648_v4   ;;  %v789_v4 = vld [vmem:[#allocation4] sm:$0xff] }
 0x2b7   : > { %810 = vperm.xlu1 %1636, %v1650_v5  }
 0x323   : > { %v776_v8 = vpop.xlane.xlu0 %775 }
 0x324   : > { %v782_v10 = vadd.f32 %v776_v8, %v766_v7 }
 0x326   : > { %787 = vst.msk [vmem:[#allocation3 + $0x10] sm:$0xff] %vm369_vm2, %v782_v10 }
 0x327   : > { %v773_v12 = vpop.xlane.xlu1 %772 }
 0x328   : > { %v781_v14 = vadd.f32 %v773_v12, %v765_v11 }
 0x32a   : > { %786 = vst.msk [vmem:[#allocation3 + $0x8] sm:$0xff] %vm369_vm2, %v781_v14 }
 0x32b   : > { %v779_v17 = vpop.xlane.xlu1 %778  ;;  %v806_v38 = vpop.permute.xlu0 %805 }
 0x32c   : > { %v783_v19 = vadd.f32 %v779_v17, %v767_v15  ;;  %v815_v42 = vmul.f32 %v806_v38, %v791_v37 }
 0x32d   : > { %v1130_v24 = vld [vmem:[#allocation3 + $0x10] sm:$0xff] }
 0x32e   : > { %788 = vst.msk [vmem:[#allocation3 + $0x18] sm:$0xff] %vm369_vm2, %v783_v19 }
 0x32f   : > { %v770_v21 = vpop.xlane.xlu1 %769 }
 0x330   : > { %v780_v22 = vadd.f32 %v770_v21, %v764_v20 }
 0x331   : > { %v1129_v23 = vld [vmem:[#allocation3 + $0x8] sm:$0xff] }
 0x332   : > { %785 = vst.msk [vmem:[#allocation3] sm:$0xff] %vm369_vm2, %v780_v22  ;;  %1653 = vrcp.f32 %v1129_v23 }
 0x333   : > { %1655 = vrcp.f32 %v1130_v24  ;;  %v801_v35 = vpop.permute.xlu1 %800 }
 0x334   : > { %v814_v41 = vmul.f32 %v801_v35, %v790_v36 }
 0x335   : > { %v1131_v25 = vld [vmem:[#allocation3 + $0x18] sm:$0xff] }
 0x336   : > { %1657 = vrcp.f32 %v1131_v25 }
 0x337   : > { %v811_v44 = vpop.permute.xlu1 %810 }
 0x338   : > { %v816_v51 = vmul.f32 %v811_v44, %v792_v43 }
 0x339   : > { %v1128_v26 = vld [vmem:[#allocation3] sm:$0xff] }
 0x33a   : > { %1659 = vrcp.f32 %v1128_v26 }
 0x33c   : > { %v1654_v27 = vpop.eup %1653 }
 0x33d   : > { %1147 = vperm.xlu1 %1636, %v1654_v27   ;;  %v1656_v28 = vpop.eup %1655 }
 0x340   : > { %v1658_v29 = vpop.eup %1657 }
 0x341   : > { %1157 = vperm.xlu0 %1635, %v1658_v29   ;;  %1152 = vperm.xlu1 %1636, %v1656_v28  }
 0x344   : > { %v1660_v30 = vpop.eup %1659 }
 0x345   : > { %795 = vperm.xlu1 %1636, %v1652_v16   ;;  %1142 = vperm.xlu0 %1635, %v1660_v30   ;;  %v1455_v16 = vld [vmem:[%s2353_s4] ss:$0 sm:$0xff] }
 0x369   : > { %v890_v39 = vpop.f32.mrb[2].mxu0 }
 0x36a   : > { %v1509_v40 = vpop.f32.mrb[3].mxu0 }
 0x36c   : > { %v963_v45 = vpop.f32.mrb[6].mxu1 }
 0x36d   : > { %v1114_v46 = vadd.f32 %v963_v45, %v814_v41  ;;  %v1036_v47 = vpop.f32.mrb[4].mxu0  ;;  %v1514_v48 = vpop.f32.mrb[7].mxu1 }
 0x36e   : > { %v1115_v49 = vadd.f32 %v1036_v47, %v815_v42  ;;  %v1519_v50 = vpop.f32.mrb[5].mxu0 }
 0x36f   : > { %1118 = vst.msk [vmem:[#allocation4 + $0x8] sm:$0xff] %vm378_vm0, %v1114_v46 }
 0x370   : > { %1119 = vst.msk [vmem:[#allocation4 + $0x10] sm:$0xff] %vm378_vm0, %v1115_v49  ;;  %v1109_v52 = vpop.f32.mrb[8].mxu1 }
 0x371   : > { %v1116_v53 = vadd.f32 %v1109_v52, %v816_v51  ;;  %v1524_v54 = vpop.f32.mrb[9].mxu1 }
 0x373   : > { %1120 = vst.msk [vmem:[#allocation4 + $0x18] sm:$0xff] %vm378_vm0, %v1116_v53 }
 0x376   : > { %v1137_v58 = vld [vmem:[#allocation4 + $0x8] sm:$0xff] }
 0x377   : > { %v1138_v62 = vld [vmem:[#allocation4 + $0x10] sm:$0xff] }
 0x37a   : > { %v1139_v63 = vld [vmem:[#allocation4 + $0x18] sm:$0xff] }
 0x3bc   : > { %v1148_v59 = vpop.permute.xlu1 %1147 }
 0x3bd   : > { %v1161_v60 = vmul.f32 %v1148_v59, %v1137_v58 }
 0x3bf   : > { %1165 = vrot.lane.b32.xlu1 %v1161_v60, %s1882_s25 }
 0x3c0   : > { %v1153_v61 = vpop.permute.xlu1 %1152  ;;  %v1158_v1 = vpop.permute.xlu0 %1157 }
 0x3c1   : > { %v1162_v2 = vmul.f32 %v1153_v61, %v1138_v62  ;;  %v1163_v3 = vmul.f32 %v1158_v1, %v1139_v63 }
 0x3c3   : > { %1173 = vrot.lane.b32.xlu1 %v1163_v3, %s1883_s8  ;;  %1169 = vrot.lane.b32.xlu0 %v1162_v2, %s1884_s29 }
 0x3c4   : > { %v796_v5 = vpop.permute.xlu1 %795  ;;  %v1143_v8 = vpop.permute.xlu0 %1142 }
 0x3c5   : > { %v813_v0 = vmul.f32 %v796_v5, %v789_v4 }
 0x3c7   : > { %v1113_v6 = vadd.f32 %v890_v39, %v813_v0 }
 0x3c9   : > { %1117 = vst.msk [vmem:[#allocation4] sm:$0xff] %vm378_vm0, %v1113_v6 }
 0x3d0   : > { %v1136_v7 = vld [vmem:[#allocation4] sm:$0xff] }
 0x3d1   : > { %v1160_v10 = vmul.f32 %v1143_v8, %v1136_v7 }
 0x431   : > { %v1166_v9 = vpop.permute.xlu1 %1165 }
 0x432   : > { %v1176_v11 = vsel %vm378_vm0, %v1160_v10, %v1166_v9 }
 0x435   : > { %v1174_v12 = vpop.permute.xlu1 %1173  ;;  %v1170_v13 = vpop.permute.xlu0 %1169 }
 0x436   : > { %v1178_v14 = vsel %vm1177_vm3, %v1176_v11, %v1170_v13 }
 0x437   : > { %v1180_v15 = vsel %vm1179_vm4, %v1178_v14, %v1174_v12 }
 0x438   : > { %1534 = vmatmul.mubr.msk.f32.vlgmr.msra.gmra.mrb[6].mxu0 %vm1192_vm5, %v1180_v15 }
 0x50b   : > { %v1262_v17 = vpop.f32.mrb[6].mxu0 }
 0x50c   : > { %v1263_v18 = vadd.f32 %v1455_v16, %v1262_v17  ;;  %v1535_v19 = vpop.f32.mrb[7].mxu0 }
 0x50e   : > { %1266 = vst.msk [vmem:[%s364_s23] sm:$0xff] %vm1192_vm5, %v1263_v18 }
 0x50f   : > { %1792 = shalt.err (!%p1789_p4)
}
 0x510   : > { %s1793_s15 = scalar_lea.hbm %s2300_s0, 128  ;;  %s1797_s13 = scalar_lea.hbm %s2354_s5, 256 }
 0x511   : > { %p1794_p3 = scmp.ne.s32.totalorder %s2300_s0, %s1793_s15  ;;  %p1798_p8 = scmp.lt.u32.totalorder %s2300_s0, %s2354_s5 }
 0x512   : > { %p1799_p12 = scmp.lt.u32.totalorder %s1797_s13, %s1793_s15  ;;  %p1801_p2 = scmp.lt.u32.totalorder %s1793_s15, %s2300_s0 }
 0x513   : > { %p1795_p6 = pnand %p1794_p3, %p2401_p13 }
 0x514   : > { %p1800_p1 = por %p1799_p12, %p1798_p8 }
 0x515   : > { %p1796_p9 = pneg %p1795_p6 }
 0x516   : > { %p1802_p11 = por %p1801_p2, %p1800_p1 }
 0x518   : > { %p1803_p0 = pnand %p1802_p11, %p1796_p9 }
 0x51a   : > { %1806 = shalt.err (!%p1803_p0)
}
 0x51b   : > { %1552 = dma.vmem_to_hbm [thread:$0]  (%p2401_p13), %s2302_s24, 128, %s2300_s0, %s1268_s20  }
 0x51c PF: > { %s2402_s25 = sld [smem:[#allocation20_spill]]  ;;  %s1294_s8 = sand.u32 1, %s1849_s18  }
 0x51d   : > { %p2403_p5 = scmp.ne.s32.totalorder %s2387_s12, 0  ;;  %s1295_s29 = scalar_lea.sflag [#allocation7], %s1294_s8 }
 0x522   : > { %p2404_p10 = scmp.ge.s32.totalorder %s2402_s25, 2 }
 0x524   : > { %p1569_p7 = pnand %p2404_p10, %p2403_p5 }
 0x526   : > { %1844 = dma.done.wait (!%p1569_p7), %s1295_s29, 128  }
 0x527   : > { %1846 = vsyncadd (!%p1569_p7), %s1295_s29, 4294967168  ;;  %s25_s23 = sadd.s32 1, %s2402_s25   ;;  %s2405_s17 = sld [smem:[#allocation18_spill]] }
 0x528   : > { %p22_p4 = scmp.ge.s32.totalorder %s25_s23, 4   ;;  %s2406_s20 = sld [smem:[#allocation22_spill]] }
 0x529   : > { %s2407_s21 = sld [smem:[#allocation19_spill]]  ;;  %s2408_s22 = sld [smem:[#allocation21_spill]] }
 0x52a   : > { %s2409_s18 = smov %s1853_s19  ;;  %24 = sbr.rel (!%p22_p4) target bundleno = 12 (0xc), region = 121 }
 0x52d   : > { %s2410_s19 = smov %s2405_s17 }
 0x531   :  { %1300 = vsyncpa [#allocation6], 1 }
 0x532   :  { %1302 = vsyncpa [#allocation6 + $0x1], 1 }
 0x533   :  { %1303 = vsyncpa [#allocation9], 1 }
 0x534   :  { %1305 = vsyncpa [#allocation9 + $0x1], 1 }
 0x535   :  { %1306 = vsyncpa [#allocation12], 1 }
 0x536   :  { %1307 = vsyncpa [#allocation7], 1 }
 0x537   :  { %1309 = vsyncpa [#allocation7 + $0x1], 1 }

</bundles_post_ra>
